<compile_context>
chip_gen: v5e
topology: v5e:2x2
jax: 0.10.0
libtpu: 0.0.40
codegen_flags: <defaults>
</compile_context>

<pallas_src>
import functools

import jax
import jax.numpy as jnp
from jax.experimental import pallas as pl
from jax.experimental.pallas import tpu as pltpu

CLASSIFIC_LOSS_WEIGHT = 5.0   # calssific_loss_weight in the PyTorch source
FOCAL_GAMMA = 2               # focal_loss(gamma=2)


def _round_up(x, m):
    return ((x + m - 1) // m) * m


# ----------------------------------------------------------------------------
# Fused kernel: focal loss (resident, step 0) + streamed, accumulated MSE.
# ----------------------------------------------------------------------------
def _my_loss2_kernel(xT_ref, lab_ref, recon_ref, o_ref, *, batch, inv_b, inv_bd):
    i = pl.program_id(0)

    # ---- focal loss (gamma = 2); logits are (C, Bp) with batch on lanes -----
    @pl.when(i == 0)
    def _init_with_focal():
        x = xT_ref[...].astype(jnp.float32)             # (C, Bp)
        lab = lab_ref[...]                              # (1, Bp) int32
        m = jnp.max(x, axis=0, keepdims=True)           # sublane reductions
        z = x - m
        ez = jnp.exp(z)                                 # single EUP exp, reused
        denom = jnp.sum(ez, axis=0, keepdims=True)      # (1, Bp)

        onehot = (jax.lax.broadcasted_iota(jnp.int32, x.shape, 0) == lab
                  ).astype(jnp.float32)                 # class select (VPU)
        z_t = jnp.sum(z * onehot, axis=0, keepdims=True)
        ez_t = jnp.sum(ez * onehot, axis=0, keepdims=True)

        p_t = ez_t / denom                              # softmax at target
        logp_t = z_t - jnp.log(denom)                   # log_softmax at target

        lane = jax.lax.broadcasted_iota(jnp.int32, logp_t.shape, 1)
        valid = (lane < batch).astype(jnp.float32)      # mask padded batch lanes
        one_m = 1.0 - p_t
        focal = -(one_m * one_m) * logp_t * valid       # gamma = 2
        o_ref[...] = (CLASSIFIC_LOSS_WEIGHT * inv_b) * jnp.sum(focal, keepdims=True)

    # ---- streamed MSE tile: recon_ref is (4, TR, 128) = [inp, AE1, AE2, AE4] --
    inp = recon_ref[0].astype(jnp.float32)
    d1 = inp - recon_ref[1].astype(jnp.float32)
    d2 = inp - recon_ref[2].astype(jnp.float32)
    d4 = inp - recon_ref[3].astype(jnp.float32)
    tile_sum = jnp.sum(d1 * d1 + d2 * d2 + d4 * d4, keepdims=True)   # (1, 1)
    o_ref[...] += inv_bd * tile_sum


# ----------------------------------------------------------------------------
# Wrapper
# ----------------------------------------------------------------------------
def my_loss2(X, target, inputs, X_AE1, X_AE2, X_AE4, *, max_tile_rows=1024):
    # --- focal operands: transpose logits to (C, Bp), batch on the lane axis --
    C = X.shape[-1]
    X2 = X.reshape(-1, C)                               # preds.view(-1, C)
    B = X2.shape[0]
    Bp = _round_up(B, 128)
    xT = jnp.zeros((C, Bp), dtype=X2.dtype).at[:, :B].set(X2.T)
    lab = jnp.zeros((1, Bp), dtype=jnp.int32).at[0, :B].set(
        target.reshape(-1).astype(jnp.int32))

    # --- recon operands: one contiguous lane-dense (4, rows, 128) slab --------
    rdt = jnp.result_type(inputs.dtype, X_AE1.dtype, X_AE2.dtype, X_AE4.dtype)
    if not jnp.issubdtype(rdt, jnp.floating):
        rdt = jnp.float32
    n = inputs.size                                     # unpadded B*D (MSE divisor)
    stacked = jnp.stack(
        [a.reshape(-1).astype(rdt) for a in (inputs, X_AE1, X_AE2, X_AE4)], axis=0)

    rows_needed = -(-n // 128)                          # cdiv(n, 128)
    TR = _round_up(min(max_tile_rows, _round_up(rows_needed, 16)), 16)
    rows = _round_up(rows_needed, TR)
    stacked = jnp.pad(stacked, ((0, 0), (0, rows * 128 - n))).reshape(4, rows, 128)
    n_tiles = rows // TR

    kernel = functools.partial(
        _my_loss2_kernel, batch=B, inv_b=1.0 / B, inv_bd=1.0 / n)

    item = jnp.dtype(rdt).itemsize
    cost = pl.CostEstimate(
        flops=int(9 * n + 14 * B * C + 12 * B),
        transcendentals=int(B * (C + 1)),
        bytes_accessed=int(4 * n * item + X2.size * X2.dtype.itemsize + 4 * B + 4),
    )

    out = pl.pallas_call(
        kernel,
        out_shape=jax.ShapeDtypeStruct((1, 1), jnp.float32),
        grid=(n_tiles,),
        in_specs=[
            pl.BlockSpec((C, Bp), lambda i: (0, 0)),          # resident logits
            pl.BlockSpec((1, Bp), lambda i: (0, 0)),          # resident labels
            pl.BlockSpec((4, TR, 128), lambda i: (0, i, 0)),  # streamed recon slab
        ],
        out_specs=pl.BlockSpec((1, 1), lambda i: (0, 0)),     # resident accumulator
        compiler_params=pltpu.CompilerParams(
            dimension_semantics=("arbitrary",)),
        cost_estimate=cost,
    )(xT, lab, stacked)
    return out[0, 0]


# ----------------------------------------------------------------------------
# Pure-JAX reference (mirrors the PyTorch module) for a sanity check.
# ----------------------------------------------------------------------------
def my_loss2_reference(X, target, inputs, X_AE1, X_AE2, X_AE4):
    X = X.reshape(-1, X.shape[-1]).astype(jnp.float32)
    target = target.reshape(-1).astype(jnp.int32)

    logsoft = jax.nn.log_softmax(X, axis=1)
    softmax = jnp.exp(logsoft)
    p_t = jnp.take_along_axis(softmax, target[:, None], axis=1)
    logp_t = jnp.take_along_axis(logsoft, target[:, None], axis=1)
    focal = jnp.mean(-((1.0 - p_t) ** FOCAL_GAMMA) * logp_t)

    def mse(a, b):
        return jnp.mean((a.astype(jnp.float32) - b.astype(jnp.float32)) ** 2)

    return (CLASSIFIC_LOSS_WEIGHT * focal
            + mse(inputs, X_AE1) + mse(inputs, X_AE2) + mse(inputs, X_AE4))


if __name__ == "__main__":
    B, C, D = 8, 4, 24   # batch, num classes, reconstruction feature dim

    key = jax.random.PRNGKey(0)
    kx, kt, ki, k1, k2, k4 = jax.random.split(key, 6)
    X = jax.random.normal(kx, (B, C), jnp.float32)
    target = jax.random.randint(kt, (B,), 0, C, jnp.int32)
    inputs = jax.random.normal(ki, (B, D), jnp.float32)
    X_AE1 = jax.random.normal(k1, (B, D), jnp.float32)
    X_AE2 = jax.random.normal(k2, (B, D), jnp.float32)
    X_AE4 = jax.random.normal(k4, (B, D), jnp.float32)

    loss_fn = jax.jit(my_loss2)
    loss = loss_fn(X, target, inputs, X_AE1, X_AE2, X_AE4)
    jax.block_until_ready(loss)

    ref = my_loss2_reference(X, target, inputs, X_AE1, X_AE2, X_AE4)
    assert loss.shape == ()
    assert abs(float(loss) - float(ref)) < 1e-4, (float(loss), float(ref))

    print("KERNEL_OK")
</pallas_src>

<mosaic_0001>
module attributes {stable_mosaic.version = 11 : i64} {
  func.func @_my_loss2_kernel(%arg0: i32, %arg1: memref<4x128xf32, #tpu.memory_space<vmem>>, %arg2: memref<1x128xi32, #tpu.memory_space<vmem>>, %arg3: memref<4x16x128xf32, #tpu.memory_space<vmem>>, %arg4: memref<1x1xf32, #tpu.memory_space<vmem>>) attributes {dimension_semantics = [#tpu.dimension_semantics<arbitrary>], iteration_bounds = array<i64: 1>, scalar_prefetch = 0 : i64, scratch_operands = 0 : i64, tpu.core_type = #tpu.core_type<tc>, window_params = [{pipeline_mode = #tpu.pipeline_mode<synchronous>, transform_indices = @transform_0, window_bounds = array<i64: 4, 128>}, {pipeline_mode = #tpu.pipeline_mode<synchronous>, transform_indices = @transform_1, window_bounds = array<i64: 1, 128>}, {transform_indices = @transform_2, window_bounds = array<i64: 4, 16, 128>}, {pipeline_mode = #tpu.pipeline_mode<synchronous>, transform_indices = @transform_3, window_bounds = array<i64: 1, 1>}]} {
    %c0_i32 = arith.constant 0 : i32
    %0 = arith.cmpi eq, %arg0, %c0_i32 : i32
    %1 = arith.extui %0 : i1 to i32
    %c0_i32_0 = arith.constant 0 : i32
    %2 = arith.cmpi ne, %1, %c0_i32_0 : i32
    scf.if %2 {
      %c0_14 = arith.constant 0 : index
      %c0_15 = arith.constant 0 : index
      %29 = vector.load %arg1[%c0_14, %c0_15] : memref<4x128xf32, #tpu.memory_space<vmem>>, vector<4x128xf32>
      %c0_16 = arith.constant 0 : index
      %c0_17 = arith.constant 0 : index
      %30 = vector.load %arg2[%c0_16, %c0_17] : memref<1x128xi32, #tpu.memory_space<vmem>>, vector<1x128xi32>
      %cst_18 = arith.constant dense<0xFF800000> : vector<128xf32>
      %31 = vector.multi_reduction <maximumf>, %29, %cst_18 [0] : vector<4x128xf32> to vector<128xf32>
      %32 = vector.shape_cast %31 : vector<128xf32> to vector<1x128xf32>
      %33 = vector.broadcast %32 : vector<1x128xf32> to vector<4x128xf32>
      %34 = arith.subf %29, %33 : vector<4x128xf32>
      %35 = math.exp %34 : vector<4x128xf32>
      %cst_19 = arith.constant dense<0.000000e+00> : vector<128xf32>
      %36 = vector.multi_reduction <add>, %35, %cst_19 [0] : vector<4x128xf32> to vector<128xf32>
      %37 = vector.shape_cast %36 : vector<128xf32> to vector<1x128xf32>
      %38 = tpu.iota {dimensions = array<i32: 0>} : vector<4x128xi32>
      %39 = vector.broadcast %30 : vector<1x128xi32> to vector<4x128xi32>
      %40 = arith.cmpi eq, %38, %39 : vector<4x128xi32>
      %41 = arith.extui %40 : vector<4x128xi1> to vector<4x128xi32>
      %42 = arith.sitofp %41 : vector<4x128xi32> to vector<4x128xf32>
      %43 = arith.mulf %34, %42 : vector<4x128xf32>
      %cst_20 = arith.constant dense<0.000000e+00> : vector<128xf32>
      %44 = vector.multi_reduction <add>, %43, %cst_20 [0] : vector<4x128xf32> to vector<128xf32>
      %45 = vector.shape_cast %44 : vector<128xf32> to vector<1x128xf32>
      %46 = arith.mulf %35, %42 : vector<4x128xf32>
      %cst_21 = arith.constant dense<0.000000e+00> : vector<128xf32>
      %47 = vector.multi_reduction <add>, %46, %cst_21 [0] : vector<4x128xf32> to vector<128xf32>
      %48 = vector.shape_cast %47 : vector<128xf32> to vector<1x128xf32>
      %49 = arith.divf %48, %37 : vector<1x128xf32>
      %50 = math.log %37 : vector<1x128xf32>
      %51 = arith.subf %45, %50 : vector<1x128xf32>
      %52 = tpu.iota {dimensions = array<i32: 1>} : vector<1x128xi32>
      %c8_i32 = arith.constant 8 : i32
      %53 = vector.broadcast %c8_i32 : i32 to vector<1x128xi32>
      %54 = arith.cmpi slt, %52, %53 : vector<1x128xi32>
      %55 = arith.extui %54 : vector<1x128xi1> to vector<1x128xi32>
      %56 = arith.sitofp %55 : vector<1x128xi32> to vector<1x128xf32>
      %cst_22 = arith.constant 1.000000e+00 : f32
      %57 = vector.broadcast %cst_22 : f32 to vector<1x128xf32>
      %58 = arith.subf %57, %49 : vector<1x128xf32>
      %59 = arith.mulf %58, %58 : vector<1x128xf32>
      %cst_23 = arith.constant 0.000000e+00 : f32
      %60 = vector.broadcast %cst_23 : f32 to vector<1x128xf32>
      %61 = arith.subf %60, %59 : vector<1x128xf32>
      %62 = arith.mulf %61, %51 : vector<1x128xf32>
      %63 = arith.mulf %62, %56 : vector<1x128xf32>
      %64 = vector.shape_cast %63 : vector<1x128xf32> to vector<1x1x128xf32>
      %cst_24 = arith.constant dense<0.000000e+00> : vector<1xf32>
      %65 = vector.multi_reduction <add>, %64, %cst_24 [1, 2] : vector<1x1x128xf32> to vector<1xf32>
      %66 = vector.shape_cast %65 : vector<1xf32> to vector<1x1x1xf32>
      %67 = vector.extract %66[0, 0, 0] : f32 from vector<1x1x1xf32>
      %68 = vector.broadcast %67 : f32 to vector<1x1xf32>
      %cst_25 = arith.constant 6.250000e-01 : f32
      %69 = vector.broadcast %cst_25 : f32 to vector<1x1xf32>
      %70 = arith.mulf %69, %68 : vector<1x1xf32>
      %c0_26 = arith.constant 0 : index
      %c0_27 = arith.constant 0 : index
      %71 = vector.load %arg4[%c0_26, %c0_27] : memref<1x1xf32, #tpu.memory_space<vmem>>, vector<1x1xf32>
      tpu.vector_store %arg4[%c0_26, %c0_27], %70 {strides = array<i32>} : memref<1x1xf32, #tpu.memory_space<vmem>>, vector<1x1xf32>,
    } else {
    }
    %c0 = arith.constant 0 : index
    %c0_1 = arith.constant 0 : index
    %c0_2 = arith.constant 0 : index
    %3 = vector.load %arg3[%c0, %c0_1, %c0_2] : memref<4x16x128xf32, #tpu.memory_space<vmem>>, vector<1x16x128xf32>
    %4 = vector.shape_cast %3 : vector<1x16x128xf32> to vector<16x128xf32>
    %c1 = arith.constant 1 : index
    %c0_3 = arith.constant 0 : index
    %c0_4 = arith.constant 0 : index
    %5 = vector.load %arg3[%c1, %c0_3, %c0_4] : memref<4x16x128xf32, #tpu.memory_space<vmem>>, vector<1x16x128xf32>
    %6 = vector.shape_cast %5 : vector<1x16x128xf32> to vector<16x128xf32>
    %7 = arith.subf %4, %6 : vector<16x128xf32>
    %c2 = arith.constant 2 : index
    %c0_5 = arith.constant 0 : index
    %c0_6 = arith.constant 0 : index
    %8 = vector.load %arg3[%c2, %c0_5, %c0_6] : memref<4x16x128xf32, #tpu.memory_space<vmem>>, vector<1x16x128xf32>
    %9 = vector.shape_cast %8 : vector<1x16x128xf32> to vector<16x128xf32>
    %10 = arith.subf %4, %9 : vector<16x128xf32>
    %c3 = arith.constant 3 : index
    %c0_7 = arith.constant 0 : index
    %c0_8 = arith.constant 0 : index
    %11 = vector.load %arg3[%c3, %c0_7, %c0_8] : memref<4x16x128xf32, #tpu.memory_space<vmem>>, vector<1x16x128xf32>
    %12 = vector.shape_cast %11 : vector<1x16x128xf32> to vector<16x128xf32>
    %13 = arith.subf %4, %12 : vector<16x128xf32>
    %14 = arith.mulf %7, %7 : vector<16x128xf32>
    %15 = arith.mulf %10, %10 : vector<16x128xf32>
    %16 = arith.addf %14, %15 : vector<16x128xf32>
    %17 = arith.mulf %13, %13 : vector<16x128xf32>
    %18 = arith.addf %16, %17 : vector<16x128xf32>
    %19 = vector.shape_cast %18 : vector<16x128xf32> to vector<1x16x128xf32>
    %cst = arith.constant dense<0.000000e+00> : vector<1xf32>
    %20 = vector.multi_reduction <add>, %19, %cst [1, 2] : vector<1x16x128xf32> to vector<1xf32>
    %21 = vector.shape_cast %20 : vector<1xf32> to vector<1x1x1xf32>
    %22 = vector.extract %21[0, 0, 0] : f32 from vector<1x1x1xf32>
    %23 = vector.broadcast %22 : f32 to vector<1x1xf32>
    %c0_9 = arith.constant 0 : index
    %c0_10 = arith.constant 0 : index
    %24 = vector.load %arg4[%c0_9, %c0_10] : memref<1x1xf32, #tpu.memory_space<vmem>>, vector<1x1xf32>
    %cst_11 = arith.constant 0.00520833349 : f32
    %25 = vector.broadcast %cst_11 : f32 to vector<1x1xf32>
    %26 = arith.mulf %25, %23 : vector<1x1xf32>
    %27 = arith.addf %24, %26 : vector<1x1xf32>
    %c0_12 = arith.constant 0 : index
    %c0_13 = arith.constant 0 : index
    %28 = vector.load %arg4[%c0_12, %c0_13] : memref<1x1xf32, #tpu.memory_space<vmem>>, vector<1x1xf32>
    tpu.vector_store %arg4[%c0_12, %c0_13], %27 {strides = array<i32>} : memref<1x1xf32, #tpu.memory_space<vmem>>, vector<1x1xf32>,
    return
  }
  func.func @transform_0(%arg0: i32) -> (i32, i32) {
    %c0_i32 = arith.constant 0 : i32
    %c0_i32_0 = arith.constant 0 : i32
    %c0_i32_1 = arith.constant 0 : i32
    return %c0_i32, %c0_i32_0 : i32, i32
  }
  func.func @transform_1(%arg0: i32) -> (i32, i32) {
    %c0_i32 = arith.constant 0 : i32
    %c0_i32_0 = arith.constant 0 : i32
    %c0_i32_1 = arith.constant 0 : i32
    return %c0_i32, %c0_i32_0 : i32, i32
  }
  func.func @transform_2(%arg0: i32) -> (i32, i32, i32) {
    %c0_i32 = arith.constant 0 : i32
    %c0_i32_0 = arith.constant 0 : i32
    %c0_i32_1 = arith.constant 0 : i32
    return %c0_i32, %arg0, %c0_i32_0 : i32, i32, i32
  }
  func.func @transform_3(%arg0: i32) -> (i32, i32) {
    %c0_i32 = arith.constant 0 : i32
    %c0_i32_0 = arith.constant 0 : i32
    %c0_i32_1 = arith.constant 0 : i32
    return %c0_i32, %c0_i32_0 : i32, i32
  }
}

</mosaic_0001>

<bundles_post_ra>
// kernel: my_loss2.1
= control target key start
LH: loop header
LB: loop body
LE: loop exit
PB: predicated region body
PF: predicated region fallthrough
CT: control target
= control target key end

     0   :  { %vm21_vm0 = vcmask 1043456   ;;  %s271_s0 = inlined_call_operand.vmem [shape: f32[4,128], index: 0, kind: input, shape index: {}]   ;;  %s272_s1 = inlined_call_operand.vmem [shape: s32[1,128], index: 1, kind: input, shape index: {}]   ;;  %s273_s2 = inlined_call_operand.vmem [shape: f32[4,16,128], index: 2, kind: input, shape index: {}]   ;;  %s274_s3 = inlined_call_operand.hbm [shape: f32[1,1], index: 3, kind: output, shape index: {}]  }
   0x1   :  { %v19_v0 = vld [vmem:[%s271_s0] sm:$0xf] }
   0x2   :  { %v22_v1 = vsel %vm21_vm0, %v19_v0, -inf }
   0x3   :  { %8 = vsyncpa [#allocation3], 0  ;;  %v23_v2 = vrot.slane %v22_v1, 4  ;;  %v39_v7 = vlaneseq  ;;  %v177_v11 = vld [vmem:[%s272_s1] ss:$0 sm:$0xff]  ;;  %v210_v13 = vmov 0.0  }
   0x4   :  { %v104_v47 = vld [vmem:[%s273_s2] sm:$0xff]  ;;  %v105_v48 = vld [vmem:[%s273_s2 + $0x8] sm:$0xff]  ;;  %v165_v49 = vld [vmem:[%s273_s2 + $0x10] sm:$0xff]  ;;  %vm89_vm7 = vcmask 1040384   ;;  %vm102_vm8 = vcmask 0   ;;  %s211_s4 = smov [#allocation2]  }
   0x5   :  { %v24_v3 = vmax.f32 %v22_v1, %v23_v2  ;;  %v40_v10 = vshrl.u32 %v39_v7, 7  ;;  %v166_v51 = vld [vmem:[%s273_s2 + $0x18] sm:$0xff]  ;;  %v167_v52 = vld [vmem:[%s273_s2 + $0x20] sm:$0xff]  ;;  %v168_v53 = vld [vmem:[%s273_s2 + $0x28] sm:$0xff]  ;;  %v80_v55 = vand.u32 127, %v39_v7  ;;  %v109_v59 = vsub.f32 %v104_v47, %v165_v49  ;;  %s152_s5 = sshll.u32 %s211_s4, 4  ;;  %s153_s5 = int_to_ptr.vmem [resolvable:$true] %s152_s5 }
   0x6   :  { %v110_v60 = vsub.f32 %v105_v48, %v166_v51  ;;  %v114_v61 = vsub.f32 %v104_v47, %v167_v52  ;;  %v115_v62 = vsub.f32 %v105_v48, %v168_v53  ;;  %v169_v63 = vld [vmem:[%s273_s2 + $0x30] sm:$0xff]  ;;  %s154_s8 = sshll.u32 %s274_s3, 4  ;;  %s155_s8 = int_to_ptr.hbm [resolvable:$true] %s154_s8 }
   0x7   :  { %v25_v4 = vrot.slane %v24_v3, 2  ;;  %vm42_vm1 = vcmp.eq.s32.totalorder %v40_v10, %v177_v11  ;;  %vm81_vm6 = vcmp.lt.s32.totalorder %v80_v55, 8 }
   0x8   :  { %v163_v14 = vsel %vm42_vm1, 1.0, %v210_v13  ;;  %v122_v7 = vmul.f32 %v110_v60, %v110_v60  ;;  %v164_v11 = vsel %vm81_vm6, 1.0, %v210_v13 }
   0x9   :  { %v26_v5 = vmax.f32 %v24_v3, %v25_v4  ;;  %v119_v4 = vsub.f32 %v104_v47, %v169_v63 }
   0xb   :  { %v27_v6 = vrot.slane %v26_v5, 1 }
   0xd   :  { %v28_v8 = vmax.f32 %v26_v5, %v27_v6  ;;  %v121_v6 = vmul.f32 %v109_v59, %v109_v59 }
   0xf   :  { %v29_v9 = vsub.f32 %v19_v0, %v28_v8  ;;  %v170_v0 = vld [vmem:[%s273_s2 + $0x38] sm:$0xff]  ;;  %v123_v8 = vmul.f32 %v114_v61, %v114_v61 }
  0x10   :  { %v120_v5 = vsub.f32 %v105_v48, %v170_v0 }
  0x11   :  { %v30_v12 = vmul.f32 1.442695, %v29_v9  ;;  %v45_v19 = vmul.f32 %v163_v14, %v29_v9  ;;  %v124_v9 = vmul.f32 %v115_v62, %v115_v62 }
  0x13   :  { %178 = vpow2.f32 %v30_v12  ;;  %v46_v24 = vsel %vm21_vm0, %v45_v19, 0.0 }
  0x14   :  { %v47_v27 = vrot.slane %v46_v24, 4 }
  0x16   :  { %v48_v30 = vadd.f32 %v47_v27, %v46_v24 }
  0x18   :  { %v49_v32 = vrot.slane %v48_v30, 2 }
  0x19   :  { %v179_v15 = vpop.eup %178 }
  0x1a   :  { %v32_v16 = vsel %vm21_vm0, %v179_v15, 0.0  ;;  %v53_v17 = vmul.f32 %v179_v15, %v163_v14  ;;  %v50_v36 = vadd.f32 %v49_v32, %v48_v30  ;;  %v125_v14 = vadd.f32 %v123_v8, %v121_v6 }
  0x1b   :  { %v33_v18 = vrot.slane %v32_v16, 4  ;;  %v126_v15 = vadd.f32 %v124_v9, %v122_v7 }
  0x1c   :  { %v54_v20 = vsel %vm21_vm0, %v53_v17, 0.0  ;;  %v51_v43 = vrot.slane %v50_v36, 1  ;;  %v128_v17 = vmul.f32 %v120_v5, %v120_v5 }
  0x1d   :  { %v34_v21 = vadd.f32 %v33_v18, %v32_v16  ;;  %v55_v23 = vrot.slane %v54_v20, 4  ;;  %v127_v16 = vmul.f32 %v119_v4, %v119_v4 }
  0x1e   :  { %v52_v56 = vadd.f32 %v51_v43, %v50_v36 }
  0x1f   :  { %v35_v22 = vrot.slane %v34_v21, 2  ;;  %v56_v28 = vadd.f32 %v55_v23, %v54_v20  ;;  %v129_v20 = vadd.f32 %v127_v16, %v125_v14 }
  0x21   :  { %v36_v25 = vadd.f32 %v35_v22, %v34_v21  ;;  %v57_v31 = vrot.slane %v56_v28, 2  ;;  %v130_v21 = vadd.f32 %v128_v17, %v126_v15 }
  0x23   :  { %v37_v26 = vrot.slane %v36_v25, 1  ;;  %v58_v33 = vadd.f32 %v57_v31, %v56_v28  ;;  %v131_v22 = vadd.f32 %v130_v21, %v129_v20 }
  0x25   :  { %v38_v29 = vadd.f32 %v37_v26, %v36_v25  ;;  %v59_v37 = vrot.slane %v58_v33, 1 }
  0x27   :  { %180 = vrcp.f32 %v38_v29  ;;  %v72_v38 = vand.u32 2147483648, %v38_v29  ;;  %vm66_vm2 = vweird.f32 %v38_v29  ;;  %v70_v40 = vand.u32 2147483647, %v38_v29 }
  0x28   :  { %182 = vlog2.f32 %v38_v29  ;;  %v60_v44 = vadd.f32 %v59_v37, %v58_v33 }
  0x29   :  { %v73_v42 = vor.u32 1.1754944e-38, %v72_v38  ;;  %vm71_vm5 = vcmp.eq.f32.partialorder %v70_v40, 8.507059e+37 }
  0x2d   :  { %v181_v34 = vpop.eup %180 }
  0x2e   :  { %v62_v35 = vmul.f32 %v181_v34, %v38_v29  ;;  %vm67_vm3 = vweird.f32 %v181_v34  ;;  %v183_v46 = vpop.eup %182 }
  0x2f   :  { %vm68_vm4 = vmor %vm66_vm2, %vm67_vm3  ;;  %v77_v58 = vmul.f32 0.6931472, %v183_v46 }
  0x30   :  { %v63_v39 = vsub.f32 1.0, %v62_v35 }
  0x31   :  { %v78_v2 = vsub.f32 %v52_v56, %v77_v58 }
  0x32   :  { %v64_v41 = vmul.f32 %v181_v34, %v63_v39 }
  0x34   :  { %v65_v45 = vadd.f32 %v181_v34, %v64_v41 }
  0x36   :  { %v69_v50 = vsel %vm68_vm4, %v181_v34, %v65_v45 }
  0x37   :  { %v74_v54 = vsel %vm71_vm5, %v73_v42, %v69_v50 }
  0x38   :  { %v75_v57 = vmul.f32 %v74_v54, %v60_v44 }
  0x3a   :  { %v84_v1 = vsub.f32 1.0, %v75_v57 }
  0x3c   :  { %v85_v3 = vmul.f32 %v84_v1, %v84_v1 }
  0x3e   :  { %v86_v10 = vsub.f32 0.0, %v85_v3 }
  0x40   :  { %v87_v12 = vmul.f32 %v86_v10, %v78_v2 }
  0x42   :  { %v88_v18 = vmul.f32 %v164_v11, %v87_v12 }
  0x44   :  { %v90_v19 = vsel %vm89_vm7, %v88_v18, 0.0 }
  0x45   :  { %91 = vadd.xlane.f32.xlu0 %v90_v19 }
  0x4d   :  { %132 = vadd.xlane.f32.xlu0 %v131_v22 }
  0xb8   :  { %v92_v23 = vpop.xlane.xlu0 %91 }
  0xb9   :  { %v93_v24 = vrot.slane %v92_v23, 4 }
  0xbb   :  { %v94_v25 = vadd.f32 %v93_v24, %v92_v23 }
  0xbd   :  { %v95_v26 = vrot.slane %v94_v25, 2 }
  0xbf   :  { %v96_v27 = vadd.f32 %v95_v26, %v94_v25 }
  0xc0   :  { %v133_v28 = vpop.xlane.xlu0 %132 }
  0xc1   :  { %v134_v13 = vrot.slane %v133_v28, 4  ;;  %v97_v29 = vrot.slane %v96_v27, 1 }
  0xc3   :  { %v135_v30 = vadd.f32 %v134_v13, %v133_v28  ;;  %v98_v31 = vadd.f32 %v97_v29, %v96_v27 }
  0xc5   :  { %v136_v32 = vrot.slane %v135_v30, 2  ;;  %171 = vpush %v98_v31 }
  0xc7   :  { %v137_v33 = vadd.f32 %v136_v32, %v135_v30 }
  0xc9   :  { %v138_v34 = vrot.slane %v137_v33, 1 }
  0xcb   :  { %v139_v35 = vadd.f32 %v138_v34, %v137_v33 }
  0xcd   :  { %173 = vpush %v139_v35 }
  0xf6   :  { %s172_s2 = spop %171 }
  0xf7   :  { %v100_v36 = vstv %s172_s2 }
  0xf8   :  { %v101_v37 = vmul.f32 0.625, %v100_v36 }
  0xfa   :  { %103 = vst.msk [vmem:[#allocation2] sm:$0x1] %vm102_vm8, %v101_v37 }
  0xfe   :  { %s174_s30 = spop %173 }
  0xff   :  { %v141_v38 = vstv %s174_s30 }
 0x100   :  { %v143_v39 = vmul.f32 0.0052083335, %v141_v38 }
 0x101   :  { %v142_v40 = vld [vmem:[#allocation2] sm:$0x1] }
 0x102   :  { %v144_v41 = vadd.f32 %v143_v39, %v142_v40 }
 0x104   :  { %146 = vst.msk [vmem:[#allocation2] sm:$0x1] %vm102_vm8, %v144_v41 }
 0x105   :  { %157 = dma.vmem_to_hbm [thread:$0]  %s153_s5, 16, %s155_s8, [#allocation3]  }
 0x106   :  { %208 = dma.done.wait [#allocation3], 16  }
 0x107   :  { %209 = vsyncadd [#allocation3], 4294967280 }
 0x108   :  { %162 = vsyncpa [#allocation3], 1 }

</bundles_post_ra>
